<compile_context>
chip_gen: v7x
topology: tpu7x:2x2x1
jax: 0.10.0
libtpu: 0.0.40
codegen_flags: <defaults>
</compile_context>

<pallas_src>
import functools

import jax
import jax.numpy as jnp
from jax.experimental import pallas as pl
from jax.experimental.pallas import tpu as pltpu

_TARGET_BLOCK_ELEMS = 512 * 1024   # ~2 MiB/block at f32 (1 MiB at bf16): on the HBM
                                   # roofline plateau, and 2 bufs x (in+out) + f32
                                   # temps fit every generation's scoped VMEM default.
_MIN_PALLAS_BYTES = 64 * 1024      # below this, launch overhead dominates -> use XLA.
_LANE = 128
_WIDTHS = (4096, 2048, 1024, 512, 256, 128)


def _cdiv(a, b):
    return -(-a // b)


def _round_up(a, b):
    return _cdiv(a, b) * b


def _quantize_kernel(x_ref, o_ref, *, n):
    # Elementwise round(x * n) / n in f32; round-half-to-even == torch.round.
    x = x_ref[...].astype(jnp.float32)
    o_ref[...] = (jnp.round(x * n) / n).astype(o_ref.dtype)


def _choose_tile(extent, unit, target):
    """Tile one axis: tile is a multiple of `unit` (or == extent when extent <= unit),
    aims at `target` elements per tile, and prefers an even number (>= 2) of grid
    steps so both v7x TensorCores get balanced work. Last block may be partial."""
    if extent <= unit:
        return extent, 1                      # full-dim block is always legal
    cap = max(unit, (target // unit) * unit)  # ~2 MiB-equivalent tile cap
    steps = _cdiv(extent, cap)
    if steps < 2:
        steps = 2
    elif steps % 2:
        steps += 1                            # even split across the 2 TCs on v7x
    tile = _round_up(_cdiv(extent, steps), unit)
    steps = _cdiv(extent, tile)
    return tile, steps


def activation_quantize(x, bit_list):
    """JAX/Pallas equivalent of activation_quantize_fn(bit_list)(x)."""
    abit = bit_list[-1]
    assert abit <= 8 or abit == 32
    if abit == 32:
        return x

    n = float(2 ** abit - 1)
    orig_shape = x.shape
    itemsize = jnp.dtype(x.dtype).itemsize
    total = int(x.size)

    # Small-tensor early-out: XLA fuses this into a single pass; pallas_call overhead
    # would dominate at this size.
    if total * itemsize < _MIN_PALLAS_BYTES:
        return (jnp.round(x.astype(jnp.float32) * n) / n).astype(x.dtype)

    kernel = functools.partial(_quantize_kernel, n=n)
    cost = pl.CostEstimate(
        flops=3 * total,
        transcendentals=total,                 # f32 true divide goes through the EUP
        bytes_accessed=2 * total * itemsize,
    )
    params = pltpu.CompilerParams(dimension_semantics=("parallel",))
    sub = {4: 8, 2: 16, 1: 32}.get(itemsize, 8)

    flat = x.reshape(-1)

    # Preferred path: lane-dense 2-D slab (free reshape), widest width dividing total.
    width = next((w for w in _WIDTHS if total % w == 0), None)
    if width is not None:
        rows = total // width
        x2d = flat.reshape(rows, width)
        tr, steps = _choose_tile(rows, sub, max(sub, _TARGET_BLOCK_ELEMS // width))
        out2d = pl.pallas_call(
            kernel,
            out_shape=jax.ShapeDtypeStruct((rows, width), x.dtype),
            grid_spec=pltpu.PrefetchScalarGridSpec(
                num_scalar_prefetch=0,
                grid=(steps,),
                in_specs=[pl.BlockSpec((tr, width), lambda i: (i, 0))],
                out_specs=pl.BlockSpec((tr, width), lambda i: (i, 0)),
            ),
            compiler_params=params,
            cost_estimate=cost,
        )(x2d)
        return out2d.reshape(orig_shape)

    # Fallback path (total not divisible by 128): 1-D blocked stream, cdiv grid with a
    # short masked final block. No pad, no slice -> still exactly one HBM pass each way.
    blk, steps = _choose_tile(total, 8 * _LANE, _TARGET_BLOCK_ELEMS)
    out = pl.pallas_call(
        kernel,
        out_shape=jax.ShapeDtypeStruct((total,), x.dtype),
        grid_spec=pltpu.PrefetchScalarGridSpec(
            num_scalar_prefetch=0,
            grid=(steps,),
            in_specs=[pl.BlockSpec((blk,), lambda i: (i,))],
            out_specs=pl.BlockSpec((blk,), lambda i: (i,)),
        ),
        compiler_params=params,
        cost_estimate=cost,
    )(flat)
    return out.reshape(orig_shape)


if __name__ == "__main__":
    bit_list = [2, 4]           # abit = bit_list[-1] = 4
    abit = bit_list[-1]
    n = float(2 ** abit - 1)

    def ref(v):
        return (jnp.round(v.astype(jnp.float32) * n) / n).astype(v.dtype)

    key = jax.random.PRNGKey(0)
    k1, k2, k3, k4 = jax.random.split(key, 4)

    # 1) Aligned lane-dense 2-D path (32768 elements -> (8, 4096) slab).
    x = jax.random.uniform(k1, (2, 16, 32, 32), dtype=jnp.float32)
    y = jax.block_until_ready(activation_quantize(x, bit_list))
    assert y.shape == x.shape and y.dtype == x.dtype
    assert jnp.allclose(y, ref(x), atol=1e-6), "mismatch (aligned 2-D path)"

    # 2) Aligned width but awkward row count -> partial final row block (no tile collapse).
    x_odd = jax.random.uniform(k2, (2, 17, 32, 32), dtype=jnp.float32)
    y_odd = jax.block_until_ready(activation_quantize(x_odd, bit_list))
    assert jnp.allclose(y_odd, ref(x_odd), atol=1e-6), "mismatch (partial-block path)"

    # 3) Element count not divisible by 128 -> 1-D blocked path with masked tail
    #    (no jnp.pad / output slice).
    x_un = jax.random.uniform(k3, (3, 7, 33, 65), dtype=jnp.float32)
    y_un = jax.block_until_ready(activation_quantize(x_un, bit_list))
    assert y_un.shape == x_un.shape and jnp.allclose(y_un, ref(x_un), atol=1e-6), \
        "mismatch (unaligned 1-D path)"

    # 4) bf16 I/O -> in-kernel f32 upcast (halved HBM traffic, same math).
    xb = x.astype(jnp.bfloat16)
    yb = jax.block_until_ready(activation_quantize(xb, bit_list))
    assert yb.dtype == jnp.bfloat16
    assert jnp.allclose(yb.astype(jnp.float32), ref(xb).astype(jnp.float32), atol=1e-2), \
        "mismatch (bf16 path)"

    # 5) Tiny tensor -> fused-XLA early-out path.
    x_tiny = jax.random.uniform(k4, (2, 4, 16, 16), dtype=jnp.float32)
    y_tiny = jax.block_until_ready(activation_quantize(x_tiny, bit_list))
    assert jnp.allclose(y_tiny, ref(x_tiny), atol=1e-6), "mismatch (tiny path)"

    # 6) 32-bit path is identity.
    y32 = jax.block_until_ready(activation_quantize(x, [32]))
    assert jnp.array_equal(y32, x)

    print("KERNEL_OK")
</pallas_src>

<mosaic_0001>
module attributes {stable_mosaic.version = 11 : i64} {
  func.func @_quantize_kernel(%arg0: i32, %arg1: memref<8x4096xf32, #tpu.memory_space<vmem>>, %arg2: memref<8x4096xf32, #tpu.memory_space<vmem>>) attributes {dimension_semantics = [#tpu.dimension_semantics<parallel>], iteration_bounds = array<i64: 1>, scalar_prefetch = 0 : i64, scratch_operands = 0 : i64, tpu.core_type = #tpu.core_type<tc>, window_params = [{transform_indices = @transform_0, window_bounds = array<i64: 8, 4096>}, {transform_indices = @transform_1, window_bounds = array<i64: 8, 4096>}]} {
    %c0 = arith.constant 0 : index
    %c0_0 = arith.constant 0 : index
    %0 = vector.load %arg1[%c0, %c0_0] : memref<8x4096xf32, #tpu.memory_space<vmem>>, vector<8x4096xf32>
    %cst = arith.constant 1.500000e+01 : f32
    %1 = vector.broadcast %cst : f32 to vector<8x4096xf32>
    %2 = arith.mulf %0, %1 : vector<8x4096xf32>
    %3 = math.roundeven %2 : vector<8x4096xf32>
    %cst_1 = arith.constant 1.500000e+01 : f32
    %4 = vector.broadcast %cst_1 : f32 to vector<8x4096xf32>
    %5 = arith.divf %3, %4 : vector<8x4096xf32>
    %c0_2 = arith.constant 0 : index
    %c0_3 = arith.constant 0 : index
    %6 = vector.load %arg2[%c0_2, %c0_3] : memref<8x4096xf32, #tpu.memory_space<vmem>>, vector<8x4096xf32>
    tpu.vector_store %arg2[%c0_2, %c0_3], %5 {strides = array<i32>} : memref<8x4096xf32, #tpu.memory_space<vmem>>, vector<8x4096xf32>,
    return
  }
  func.func @transform_0(%arg0: i32) -> (i32, i32) {
    %c0_i32 = arith.constant 0 : i32
    %c0_i32_0 = arith.constant 0 : i32
    return %arg0, %c0_i32 : i32, i32
  }
  func.func @transform_1(%arg0: i32) -> (i32, i32) {
    %c0_i32 = arith.constant 0 : i32
    %c0_i32_0 = arith.constant 0 : i32
    return %arg0, %c0_i32 : i32, i32
  }
}

</mosaic_0001>

<bundles_post_ra>
// kernel: tpu_custom_call.1
= control target key start
LH: loop header
LB: loop body
LE: loop exit
PB: predicated region body
PF: predicated region fallthrough
CT: control target
= control target key end

     0   :  { %6 = vsyncpa [#allocation3], 0  ;;  %s315_s0 = inlined_call_operand.hbm [shape: f32[8,4096], index: 0, kind: input, shape index: {}]   ;;  %s316_s1 = inlined_call_operand.hbm [shape: f32[8,4096], index: 1, kind: output, shape index: {}]  }
   0x1   :  { %7 = vsyncpa [#allocation4], 0  ;;  %s279_s6 = smov [#allocation2]   ;;  %s231_s10 = scalar_lea.hbm %s315_s0, 4096 }
   0x2   :  { %s14_s7 = sshll.u32 %s279_s6, 4  ;;  %p232_p0 = scmp.ne.s32.totalorder %s315_s0, %s231_s10  ;;  %s15_s7 = int_to_ptr.vmem [resolvable:$true] %s14_s7 }
   0x3   :  { %p235_p1 = scmp.lt.u32.totalorder %s231_s10, %s315_s0 }
   0x5   :  { %p237_p2 = pnand %p235_p1, %p232_p0 }
   0x7   :  { %240 = shalt.err (!%p237_p2)
}
   0x8   :  { %s241_s15 = scalar_lea.vmem %s15_s7, 4096  ;;  %p246_p4 = scmp.lt.s32.totalorder %s15_s7, %s15_s7 }
   0x9   :  { %p242_p3 = scmp.ne.s32.totalorder %s15_s7, %s241_s15  ;;  %p247_p5 = scmp.lt.s32.totalorder %s241_s15, %s241_s15 }
   0xb   :  { %p248_p6 = por %p247_p5, %p246_p4 }
   0xd   :  { %p249_p7 = pnand %p248_p6, %p242_p3 }
   0xf   :  { %252 = shalt.err (!%p249_p7)
}
  0x10   :  { %17 = dma.hbm_to_vmem [thread:$0]  %s315_s0, 4096, %s15_s7, [#allocation3]  }
  0x11   :  { %275 = dma.done.wait [#allocation3], 4096  }
  0x12   :  { %276 = vsyncadd [#allocation3], 4294963200  ;;  %v21_v0 = vld [vmem:[#allocation2] sm:$0xff]  ;;  %v22_v1 = vld [vmem:[#allocation2 + $0x8] sm:$0xff]  ;;  %s280_s0 = smov [#allocation5]  }
  0x13   :  { %v23_v2 = vld [vmem:[#allocation2 + $0x10] sm:$0xff]  ;;  %v53_v3 = vmul.f32 15.0, %v21_v0  ;;  %v54_v4 = vmul.f32 15.0, %v22_v1  ;;  %v24_v6 = vld [vmem:[#allocation2 + $0x18] sm:$0xff]  ;;  %v25_v7 = vld [vmem:[#allocation2 + $0x20] sm:$0xff]  ;;  %s188_s18 = sshll.u32 %s280_s0, 4  ;;  %s189_s18 = int_to_ptr.vmem [resolvable:$true] %s188_s18 }
  0x14   :  { %v55_v5 = vmul.f32 15.0, %v23_v2  ;;  %v26_v8 = vld [vmem:[#allocation2 + $0x28] sm:$0xff]  ;;  %v56_v9 = vmul.f32 15.0, %v24_v6  ;;  %v57_v10 = vmul.f32 15.0, %v25_v7  ;;  %v27_v12 = vld [vmem:[#allocation2 + $0x30] sm:$0xff]  ;;  %v28_v13 = vld [vmem:[#allocation2 + $0x38] sm:$0xff]  ;;  %p258_p9 = scmp.lt.s32.totalorder %s189_s18, %s189_s18 }
  0x15   :  { %v58_v11 = vmul.f32 15.0, %v26_v8  ;;  %v29_v14 = vld [vmem:[#allocation2 + $0x40] sm:$0xff]  ;;  %v197_v15 = vround.rtne.f32 %v53_v3  ;;  %v198_v16 = vround.rtne.f32 %v54_v4  ;;  %v59_v18 = vmul.f32 15.0, %v27_v12  ;;  %v30_v19 = vld [vmem:[#allocation2 + $0x48] sm:$0xff]  ;;  %v31_v20 = vld [vmem:[#allocation2 + $0x50] sm:$0xff]  ;;  %s253_s19 = scalar_lea.vmem %s189_s18, 4096 }
  0x16   :  { %v199_v17 = vround.rtne.f32 %v55_v5  ;;  %v32_v21 = vld [vmem:[#allocation2 + $0x58] sm:$0xff]  ;;  %v200_v22 = vround.rtne.f32 %v56_v9  ;;  %v201_v23 = vround.rtne.f32 %v57_v10  ;;  %v60_v25 = vmul.f32 15.0, %v28_v13  ;;  %v33_v26 = vld [vmem:[#allocation2 + $0x60] sm:$0xff]  ;;  %v34_v27 = vld [vmem:[#allocation2 + $0x68] sm:$0xff]  ;;  %p254_p8 = scmp.ne.s32.totalorder %s189_s18, %s253_s19  ;;  %p259_p10 = scmp.lt.s32.totalorder %s253_s19, %s253_s19 }
  0x17   :  { %v202_v24 = vround.rtne.f32 %v58_v11  ;;  %v35_v28 = vld [vmem:[#allocation2 + $0x70] sm:$0xff]  ;;  %v118_v29 = vmul.f32 0.06666667, %v197_v15  ;;  %v119_v30 = vmul.f32 0.06666667, %v198_v16  ;;  %v203_v32 = vround.rtne.f32 %v59_v18  ;;  %v36_v41 = vld [vmem:[#allocation2 + $0x78] sm:$0xff] }
  0x18   :  { %v120_v31 = vmul.f32 0.06666667, %v199_v17  ;;  %v121_v33 = vmul.f32 0.06666667, %v200_v22  ;;  %v122_v34 = vmul.f32 0.06666667, %v201_v23  ;;  %v204_v36 = vround.rtne.f32 %v60_v25  ;;  %p260_p11 = por %p259_p10, %p258_p9 }
  0x19   :  { %v123_v35 = vmul.f32 0.06666667, %v202_v24  ;;  %150 = vst [vmem:[#allocation5] sm:$0xff] %v118_v29  ;;  %151 = vst [vmem:[#allocation5 + $0x8] sm:$0xff] %v119_v30  ;;  %v124_v37 = vmul.f32 0.06666667, %v203_v32 }
  0x1a   :  { %152 = vst [vmem:[#allocation5 + $0x10] sm:$0xff] %v120_v31  ;;  %v61_v38 = vmul.f32 15.0, %v29_v14  ;;  %v62_v39 = vmul.f32 15.0, %v30_v19  ;;  %v63_v40 = vmul.f32 15.0, %v31_v20  ;;  %153 = vst [vmem:[#allocation5 + $0x18] sm:$0xff] %v121_v33  ;;  %v64_v43 = vmul.f32 15.0, %v32_v21  ;;  %p261_p12 = pnand %p260_p11, %p254_p8 }
  0x1b   :  { %154 = vst [vmem:[#allocation5 + $0x20] sm:$0xff] %v122_v34  ;;  %155 = vst [vmem:[#allocation5 + $0x28] sm:$0xff] %v123_v35  ;;  %v125_v42 = vmul.f32 0.06666667, %v204_v36  ;;  %v65_v44 = vmul.f32 15.0, %v33_v26  ;;  %v66_v45 = vmul.f32 15.0, %v34_v27 }
  0x1c   :  { %v37_v46 = vld [vmem:[#allocation2 + $0x80] sm:$0xff]  ;;  %156 = vst [vmem:[#allocation5 + $0x30] sm:$0xff] %v124_v37  ;;  %v205_v47 = vround.rtne.f32 %v61_v38  ;;  %v206_v48 = vround.rtne.f32 %v62_v39  ;;  %v207_v49 = vround.rtne.f32 %v63_v40  ;;  %v67_v50 = vmul.f32 15.0, %v35_v28  ;;  %v38_v51 = vld [vmem:[#allocation2 + $0x88] sm:$0xff]  ;;  %v39_v52 = vld [vmem:[#allocation2 + $0x90] sm:$0xff] }
  0x1d   :  { %v40_v53 = vld [vmem:[#allocation2 + $0x98] sm:$0xff]  ;;  %157 = vst [vmem:[#allocation5 + $0x38] sm:$0xff] %v125_v42  ;;  %v208_v54 = vround.rtne.f32 %v64_v43  ;;  %v209_v55 = vround.rtne.f32 %v65_v44  ;;  %v210_v56 = vround.rtne.f32 %v66_v45  ;;  %v68_v57 = vmul.f32 15.0, %v36_v41  ;;  %v41_v58 = vld [vmem:[#allocation2 + $0xa0] sm:$0xff]  ;;  %v42_v59 = vld [vmem:[#allocation2 + $0xa8] sm:$0xff] }
  0x1e   :  { %v43_v60 = vld [vmem:[#allocation2 + $0xb0] sm:$0xff]  ;;  %v126_v61 = vmul.f32 0.06666667, %v205_v47  ;;  %v127_v62 = vmul.f32 0.06666667, %v206_v48  ;;  %v211_v0 = vround.rtne.f32 %v67_v50  ;;  %v69_v6 = vmul.f32 15.0, %v37_v46 }
  0x1f   :  { %v128_v63 = vmul.f32 0.06666667, %v207_v49  ;;  %v129_v1 = vmul.f32 0.06666667, %v208_v54  ;;  %v130_v2 = vmul.f32 0.06666667, %v209_v55  ;;  %v212_v4 = vround.rtne.f32 %v68_v57 }
  0x20   :  { %v131_v3 = vmul.f32 0.06666667, %v210_v56  ;;  %158 = vst [vmem:[#allocation5 + $0x40] sm:$0xff] %v126_v61  ;;  %159 = vst [vmem:[#allocation5 + $0x48] sm:$0xff] %v127_v62  ;;  %v132_v5 = vmul.f32 0.06666667, %v211_v0  ;;  %v213_v15 = vround.rtne.f32 %v69_v6 }
  0x21   :  { %160 = vst [vmem:[#allocation5 + $0x50] sm:$0xff] %v128_v63  ;;  %v70_v7 = vmul.f32 15.0, %v38_v51  ;;  %v71_v8 = vmul.f32 15.0, %v39_v52  ;;  %v44_v9 = vld [vmem:[#allocation2 + $0xb8] sm:$0xff]  ;;  %161 = vst [vmem:[#allocation5 + $0x58] sm:$0xff] %v129_v1  ;;  %v72_v11 = vmul.f32 15.0, %v40_v53 }
  0x22   :  { %162 = vst [vmem:[#allocation5 + $0x60] sm:$0xff] %v130_v2  ;;  %163 = vst [vmem:[#allocation5 + $0x68] sm:$0xff] %v131_v3  ;;  %v133_v10 = vmul.f32 0.06666667, %v212_v4  ;;  %v73_v12 = vmul.f32 15.0, %v41_v58  ;;  %v74_v13 = vmul.f32 15.0, %v42_v59 }
  0x23   :  { %v45_v14 = vld [vmem:[#allocation2 + $0xc0] sm:$0xff]  ;;  %164 = vst [vmem:[#allocation5 + $0x70] sm:$0xff] %v132_v5  ;;  %v214_v16 = vround.rtne.f32 %v70_v7  ;;  %v215_v17 = vround.rtne.f32 %v71_v8  ;;  %v75_v18 = vmul.f32 15.0, %v43_v60  ;;  %v46_v19 = vld [vmem:[#allocation2 + $0xc8] sm:$0xff]  ;;  %v47_v20 = vld [vmem:[#allocation2 + $0xd0] sm:$0xff]  ;;  %v216_v22 = vround.rtne.f32 %v72_v11 }
  0x24   :  { %v48_v21 = vld [vmem:[#allocation2 + $0xd8] sm:$0xff]  ;;  %165 = vst [vmem:[#allocation5 + $0x78] sm:$0xff] %v133_v10  ;;  %v217_v23 = vround.rtne.f32 %v73_v12  ;;  %v218_v24 = vround.rtne.f32 %v74_v13  ;;  %v76_v25 = vmul.f32 15.0, %v44_v9  ;;  %v49_v26 = vld [vmem:[#allocation2 + $0xe0] sm:$0xff]  ;;  %v50_v27 = vld [vmem:[#allocation2 + $0xe8] sm:$0xff]  ;;  %v77_v38 = vmul.f32 15.0, %v45_v14 }
  0x25   :  { %v51_v28 = vld [vmem:[#allocation2 + $0xf0] sm:$0xff]  ;;  %v134_v29 = vmul.f32 0.06666667, %v213_v15  ;;  %v135_v30 = vmul.f32 0.06666667, %v214_v16  ;;  %v219_v32 = vround.rtne.f32 %v75_v18  ;;  %v78_v39 = vmul.f32 15.0, %v46_v19 }
  0x26   :  { %v136_v31 = vmul.f32 0.06666667, %v215_v17  ;;  %v137_v33 = vmul.f32 0.06666667, %v216_v22  ;;  %v138_v34 = vmul.f32 0.06666667, %v217_v23  ;;  %v220_v36 = vround.rtne.f32 %v76_v25 }
  0x27   :  { %v139_v35 = vmul.f32 0.06666667, %v218_v24  ;;  %166 = vst [vmem:[#allocation5 + $0x80] sm:$0xff] %v134_v29  ;;  %167 = vst [vmem:[#allocation5 + $0x88] sm:$0xff] %v135_v30  ;;  %v140_v37 = vmul.f32 0.06666667, %v219_v32  ;;  %v221_v46 = vround.rtne.f32 %v77_v38  ;;  %v222_v47 = vround.rtne.f32 %v78_v39 }
  0x28   :  { %168 = vst [vmem:[#allocation5 + $0x90] sm:$0xff] %v136_v31  ;;  %v79_v40 = vmul.f32 15.0, %v47_v20  ;;  %v52_v41 = vld [vmem:[#allocation2 + $0xf8] sm:$0xff]  ;;  %169 = vst [vmem:[#allocation5 + $0x98] sm:$0xff] %v137_v33  ;;  %v141_v42 = vmul.f32 0.06666667, %v220_v36 }
  0x29   :  { %170 = vst [vmem:[#allocation5 + $0xa0] sm:$0xff] %v138_v34  ;;  %171 = vst [vmem:[#allocation5 + $0xa8] sm:$0xff] %v139_v35  ;;  %v80_v43 = vmul.f32 15.0, %v48_v21  ;;  %v81_v44 = vmul.f32 15.0, %v49_v26  ;;  %v82_v45 = vmul.f32 15.0, %v50_v27  ;;  %v83_v49 = vmul.f32 15.0, %v51_v28 }
  0x2a   :  { %172 = vst [vmem:[#allocation5 + $0xb0] sm:$0xff] %v140_v37  ;;  %v223_v48 = vround.rtne.f32 %v79_v40  ;;  %173 = vst [vmem:[#allocation5 + $0xb8] sm:$0xff] %v141_v42  ;;  %v84_v53 = vmul.f32 15.0, %v52_v41  ;;  %v142_v54 = vmul.f32 0.06666667, %v221_v46 }
  0x2b   :  { %v224_v50 = vround.rtne.f32 %v80_v43  ;;  %v225_v51 = vround.rtne.f32 %v81_v44  ;;  %v226_v52 = vround.rtne.f32 %v82_v45  ;;  %v143_v55 = vmul.f32 0.06666667, %v222_v47 }
  0x2c   :  { %v144_v56 = vmul.f32 0.06666667, %v223_v48  ;;  %v227_v57 = vround.rtne.f32 %v83_v49  ;;  %v228_v61 = vround.rtne.f32 %v84_v53  ;;  %174 = vst [vmem:[#allocation5 + $0xc0] sm:$0xff] %v142_v54 }
  0x2d   :  { %v145_v58 = vmul.f32 0.06666667, %v224_v50  ;;  %v146_v59 = vmul.f32 0.06666667, %v225_v51  ;;  %v147_v60 = vmul.f32 0.06666667, %v226_v52 }
  0x2e   :  { %175 = vst [vmem:[#allocation5 + $0xc8] sm:$0xff] %v143_v55  ;;  %176 = vst [vmem:[#allocation5 + $0xd0] sm:$0xff] %v144_v56  ;;  %v148_v62 = vmul.f32 0.06666667, %v227_v57  ;;  %v149_v63 = vmul.f32 0.06666667, %v228_v61 }
  0x2f   :  { %177 = vst [vmem:[#allocation5 + $0xd8] sm:$0xff] %v145_v58  ;;  %178 = vst [vmem:[#allocation5 + $0xe0] sm:$0xff] %v146_v59 }
  0x30   :  { %179 = vst [vmem:[#allocation5 + $0xe8] sm:$0xff] %v147_v60  ;;  %180 = vst [vmem:[#allocation5 + $0xf0] sm:$0xff] %v148_v62 }
  0x31   :  { %181 = vst [vmem:[#allocation5 + $0xf8] sm:$0xff] %v149_v63 }
  0x32   :  { %264 = shalt.err (!%p261_p12)
}
  0x33   :  { %s265_s22 = scalar_lea.hbm %s316_s1, 4096 }
  0x34   :  { %p266_p13 = scmp.ne.s32.totalorder %s316_s1, %s265_s22  ;;  %p269_p0 = scmp.lt.u32.totalorder %s265_s22, %s316_s1 }
  0x36   :  { %p271_p1 = pnand %p269_p0, %p266_p13 }
  0x38   :  { %274 = shalt.err (!%p271_p1)
}
  0x39   :  { %191 = dma.vmem_to_hbm [thread:$0]  %s189_s18, 4096, %s316_s1, [#allocation4]  }
  0x3a   :  { %277 = dma.done.wait [#allocation4], 4096  }
  0x3b   :  { %278 = vsyncadd [#allocation4], 4294963200 }
  0x3c   :  { %195 = vsyncpa [#allocation3], 1 }
  0x3d   :  { %196 = vsyncpa [#allocation4], 1 }

</bundles_post_ra>
